<compile_context>
chip_gen: v7x
topology: tpu7x:2x2x1
jax: 0.10.0
libtpu: 0.0.40
codegen_flags: <defaults>
</compile_context>

<pallas_src>
import functools

import jax
import jax.numpy as jnp
from jax.experimental import pallas as pl
from jax.experimental.pallas import tpu as pltpu


def title_emb_kernel(tok_ref, emb_ref, out_ref, *, vocab_subchunk, counts_dtype):
    k = pl.program_id(1)
    nk = pl.num_programs(1)

    tok = tok_ref[...]                       # (TB, L) int32
    tb, seq_len = tok.shape
    tv = emb_ref.shape[0]                    # vocab rows in this K tile (static)

    @pl.when(k == 0)
    def _init():
        out_ref[...] = jnp.zeros_like(out_ref)

    # Sub-chunked one-hot counting: the live counts block is (TB, sub), fits in
    # vregs (never spills), and feeds the MXU immediately (review fix 1).
    for start in range(0, tv, vocab_subchunk):          # static -> unrolled
        size = min(vocab_subchunk, tv - start)
        vocab_ids = (jax.lax.broadcasted_iota(jnp.int32, (tb, size), 1)
                     + (k * tv + start))
        counts = jnp.zeros((tb, size), counts_dtype)
        for l in range(seq_len):                        # L static & small -> unrolled
            counts = counts + (tok[:, l:l + 1] == vocab_ids).astype(counts_dtype)
        # Sum of gathered rows over this vocab slice == counts @ emb (MXU);
        # accumulate straight into the resident f32 output block (review fix 4).
        out_ref[...] += jnp.dot(
            counts.astype(emb_ref.dtype),
            emb_ref[start:start + size, :],
            preferred_element_type=jnp.float32)

    @pl.when(k == nk - 1)
    def _finalize():
        # Exact length + exact divide (review fix 10).  All-padding rows give
        # 0/0 = NaN, matching the PyTorch forward.
        length = jnp.sum((tok != 0).astype(jnp.float32), axis=1, keepdims=True)
        out_ref[...] = out_ref[...] / length


def _pick_batch_tile(b, candidates=(128, 64, 32, 16, 8)):
    # Prefer >= 2 grid steps along the (parallel) batch axis so both v7x
    # TensorCores get work (review fix 5), then fall back to any divisor.
    for c in candidates:
        if b % c == 0 and b // c >= 2:
            return c
    for c in candidates:
        if b % c == 0:
            return c
    return b                                  # full dim is exempt from the /8 rule


def _pick_vocab_tile(v, h, itemsize, budget_bytes):
    # Whole table when it fits the budget: the emb block index is then constant
    # over the grid and the table is DMA'd from HBM exactly once (review fix 3).
    if v * h * itemsize <= budget_bytes:
        return v
    max_rows = max(8, (budget_bytes // (h * itemsize)) // 8 * 8)
    start = (min(v, max_rows) // 8) * 8
    for d in range(start, 7, -8):
        if v % d == 0:
            return d
    raise ValueError(
        "No vocab tile (multiple of 8, within the VMEM budget) divides "
        f"V={v}; pre-pad the embedding table ONCE, outside the forward pass.")


def title_embeddings(title_tok, emb_table, *, batch_tile=None, vocab_tile=None,
                     vocab_subchunk=None, counts_dtype=None,
                     table_vmem_budget_bytes=12 * 1024 * 1024):
    """title_tok: (B, L) int32, emb_table: (V, H) float -> (B, H) float32."""
    B, L = title_tok.shape
    V, H = emb_table.shape
    itemsize = jnp.dtype(emb_table.dtype).itemsize

    if batch_tile is None:
        batch_tile = _pick_batch_tile(B)
    assert B % batch_tile == 0

    if vocab_tile is None:
        vocab_tile = _pick_vocab_tile(V, H, itemsize, table_vmem_budget_bytes)
    assert V % vocab_tile == 0

    # Counts dtype: bf16 when the table is bf16 (exact for counts <= L, halves
    # the vreg footprint, native MXU path on v6e/v7x).  Pass counts_dtype=f32
    # explicitly on v5e (no bf16 VPU there).                       (review fix 2)
    if counts_dtype is None:
        counts_dtype = (jnp.bfloat16 if emb_table.dtype == jnp.dtype(jnp.bfloat16)
                        else jnp.float32)

    # Live counts sub-block kept <= ~32 vregs (128 KiB) so it never spills.
    # v5e users may prefer 128 (native MXU K) even when 256 would fit.
    if vocab_subchunk is None:
        counts_budget = 128 * 1024
        fits256 = batch_tile * 256 * jnp.dtype(counts_dtype).itemsize <= counts_budget
        vocab_subchunk = 256 if fits256 else 128
    vocab_subchunk = min(vocab_subchunk, vocab_tile)

    grid = (B // batch_tile, V // vocab_tile)

    # VMEM: double-buffered table tile + token tile + resident output block.
    vmem_bytes = (2 * vocab_tile * H * itemsize
                  + 2 * batch_tile * L * 4
                  + 2 * batch_tile * H * 4)
    vmem_limit = min(48 * 1024 * 1024, vmem_bytes + 8 * 1024 * 1024)

    kernel = functools.partial(title_emb_kernel,
                               vocab_subchunk=vocab_subchunk,
                               counts_dtype=counts_dtype)

    return pl.pallas_call(
        kernel,
        out_shape=jax.ShapeDtypeStruct((B, H), jnp.float32),
        grid_spec=pltpu.PrefetchScalarGridSpec(
            num_scalar_prefetch=0,
            grid=grid,
            in_specs=[
                # Full L / full H trailing dims are exempt from the (8,128)
                # block-divisibility rule -> no per-call jnp.pad (review fix 7).
                pl.BlockSpec((batch_tile, L), lambda i, k: (i, 0)),
                pl.BlockSpec((vocab_tile, H), lambda i, k: (k, 0)),
            ],
            out_specs=pl.BlockSpec((batch_tile, H), lambda i, k: (i, 0)),
        ),
        compiler_params=pltpu.CompilerParams(
            dimension_semantics=("parallel", "arbitrary"),
            vmem_limit_bytes=vmem_limit,
        ),
    )(title_tok, emb_table)


if __name__ == "__main__":
    # Small, deterministic shapes that still exercise the sub-chunk loop.
    vocab_size = 512
    hidden_size = 128
    batch = 16
    seq = 8

    key = jax.random.PRNGKey(0)
    k_emb, k_tok = jax.random.split(key)

    # nn.Embedding init ~ N(0, 1); padding_idx=0 row is zeroed.
    emb_table = jax.random.normal(k_emb, (vocab_size, hidden_size), dtype=jnp.float32)
    emb_table = emb_table.at[0].set(0.0)

    # Tokens in [0, vocab); force at least one non-padding token per row
    # (PyTorch would divide by zero otherwise -- same semantics kept here).
    title_tok = jax.random.randint(k_tok, (batch, seq), 0, vocab_size, dtype=jnp.int32)
    title_tok = title_tok.at[:, 0].set(
        jnp.maximum(title_tok[:, 0], 1).astype(jnp.int32))

    # Pure-JAX reference of the PyTorch forward.
    ref_embeds = emb_table[title_tok]                                   # (B, L, H)
    ref_len = jnp.sum(title_tok != 0, axis=1).astype(jnp.float32)       # (B,)
    ref = jnp.sum(ref_embeds, axis=1) / ref_len[:, None]                # (B, H)

    # Config A: defaults -> whole table resident (nk=1), 2 counts sub-chunks,
    # 2 parallel batch-tile steps.
    out_a = jax.block_until_ready(title_embeddings(title_tok, emb_table))
    assert out_a.shape == (batch, hidden_size)
    # Approx reciprocal is gone; remaining difference is MXU f32 rounding only.
    assert jnp.allclose(out_a, ref, atol=2e-3, rtol=2e-3)

    # Config B: explicit smaller vocab tile -> exercises the k-reduction path
    # (accumulation into the resident output block across grid steps).
    out_b = jax.block_until_ready(
        title_embeddings(title_tok, emb_table, batch_tile=16, vocab_tile=256))
    assert out_b.shape == (batch, hidden_size)
    assert jnp.allclose(out_b, ref, atol=2e-3, rtol=2e-3)

    print("KERNEL_OK")
</pallas_src>

<mosaic_0001>
module attributes {stable_mosaic.version = 11 : i64} {
  func.func @title_emb_kernel(%arg0: i32, %arg1: i32, %arg2: memref<8x8xi32, #tpu.memory_space<vmem>>, %arg3: memref<512x128xf32, #tpu.memory_space<vmem>>, %arg4: memref<8x128xf32, #tpu.memory_space<vmem>>) attributes {dimension_semantics = [#tpu.dimension_semantics<parallel>, #tpu.dimension_semantics<arbitrary>], iteration_bounds = array<i64: 2, 1>, scalar_prefetch = 0 : i64, scratch_operands = 0 : i64, tpu.core_type = #tpu.core_type<tc>, window_params = [{transform_indices = @transform_0, window_bounds = array<i64: 8, 8>}, {transform_indices = @transform_1, window_bounds = array<i64: 512, 128>}, {transform_indices = @transform_2, window_bounds = array<i64: 8, 128>}]} {
    %c0 = arith.constant 0 : index
    %c0_0 = arith.constant 0 : index
    %0 = vector.load %arg2[%c0, %c0_0] : memref<8x8xi32, #tpu.memory_space<vmem>>, vector<8x8xi32>
    %c0_i32 = arith.constant 0 : i32
    %1 = arith.cmpi eq, %arg1, %c0_i32 : i32
    %2 = arith.extui %1 : i1 to i32
    %c0_i32_1 = arith.constant 0 : i32
    %3 = arith.cmpi ne, %2, %c0_i32_1 : i32
    scf.if %3 {
      %cst_20 = arith.constant 0.000000e+00 : f32
      %125 = vector.broadcast %cst_20 : f32 to vector<8x128xf32>
      %c0_21 = arith.constant 0 : index
      %c0_22 = arith.constant 0 : index
      %126 = vector.load %arg4[%c0_21, %c0_22] : memref<8x128xf32, #tpu.memory_space<vmem>>, vector<8x128xf32>
      tpu.vector_store %arg4[%c0_21, %c0_22], %125 {strides = array<i32>} : memref<8x128xf32, #tpu.memory_space<vmem>>, vector<8x128xf32>,
    } else {
    }
    %4 = tpu.iota {dimensions = array<i32: 1>} : vector<8x256xi32>
    %c512_i32 = arith.constant 512 : i32
    %5 = arith.muli %arg1, %c512_i32 : i32
    %c0_i32_2 = arith.constant 0 : i32
    %6 = arith.addi %5, %c0_i32_2 : i32
    %7 = vector.broadcast %6 : i32 to vector<8x256xi32>
    %8 = arith.addi %4, %7 : vector<8x256xi32>
    %cst = arith.constant 0.000000e+00 : f32
    %9 = vector.broadcast %cst : f32 to vector<8x256xf32>
    %10 = vector.extract_strided_slice %0 {offsets = [0, 0], sizes = [8, 1], strides = [1, 1]} : vector<8x8xi32> to vector<8x1xi32>
    %11 = vector.broadcast %10 : vector<8x1xi32> to vector<8x256xi32>
    %12 = arith.cmpi eq, %11, %8 : vector<8x256xi32>
    %13 = arith.extui %12 : vector<8x256xi1> to vector<8x256xi32>
    %14 = arith.sitofp %13 : vector<8x256xi32> to vector<8x256xf32>
    %15 = arith.addf %9, %14 : vector<8x256xf32>
    %16 = vector.extract_strided_slice %0 {offsets = [0, 1], sizes = [8, 1], strides = [1, 1]} : vector<8x8xi32> to vector<8x1xi32>
    %17 = vector.broadcast %16 : vector<8x1xi32> to vector<8x256xi32>
    %18 = arith.cmpi eq, %17, %8 : vector<8x256xi32>
    %19 = arith.extui %18 : vector<8x256xi1> to vector<8x256xi32>
    %20 = arith.sitofp %19 : vector<8x256xi32> to vector<8x256xf32>
    %21 = arith.addf %15, %20 : vector<8x256xf32>
    %22 = vector.extract_strided_slice %0 {offsets = [0, 2], sizes = [8, 1], strides = [1, 1]} : vector<8x8xi32> to vector<8x1xi32>
    %23 = vector.broadcast %22 : vector<8x1xi32> to vector<8x256xi32>
    %24 = arith.cmpi eq, %23, %8 : vector<8x256xi32>
    %25 = arith.extui %24 : vector<8x256xi1> to vector<8x256xi32>
    %26 = arith.sitofp %25 : vector<8x256xi32> to vector<8x256xf32>
    %27 = arith.addf %21, %26 : vector<8x256xf32>
    %28 = vector.extract_strided_slice %0 {offsets = [0, 3], sizes = [8, 1], strides = [1, 1]} : vector<8x8xi32> to vector<8x1xi32>
    %29 = vector.broadcast %28 : vector<8x1xi32> to vector<8x256xi32>
    %30 = arith.cmpi eq, %29, %8 : vector<8x256xi32>
    %31 = arith.extui %30 : vector<8x256xi1> to vector<8x256xi32>
    %32 = arith.sitofp %31 : vector<8x256xi32> to vector<8x256xf32>
    %33 = arith.addf %27, %32 : vector<8x256xf32>
    %34 = vector.extract_strided_slice %0 {offsets = [0, 4], sizes = [8, 1], strides = [1, 1]} : vector<8x8xi32> to vector<8x1xi32>
    %35 = vector.broadcast %34 : vector<8x1xi32> to vector<8x256xi32>
    %36 = arith.cmpi eq, %35, %8 : vector<8x256xi32>
    %37 = arith.extui %36 : vector<8x256xi1> to vector<8x256xi32>
    %38 = arith.sitofp %37 : vector<8x256xi32> to vector<8x256xf32>
    %39 = arith.addf %33, %38 : vector<8x256xf32>
    %40 = vector.extract_strided_slice %0 {offsets = [0, 5], sizes = [8, 1], strides = [1, 1]} : vector<8x8xi32> to vector<8x1xi32>
    %41 = vector.broadcast %40 : vector<8x1xi32> to vector<8x256xi32>
    %42 = arith.cmpi eq, %41, %8 : vector<8x256xi32>
    %43 = arith.extui %42 : vector<8x256xi1> to vector<8x256xi32>
    %44 = arith.sitofp %43 : vector<8x256xi32> to vector<8x256xf32>
    %45 = arith.addf %39, %44 : vector<8x256xf32>
    %46 = vector.extract_strided_slice %0 {offsets = [0, 6], sizes = [8, 1], strides = [1, 1]} : vector<8x8xi32> to vector<8x1xi32>
    %47 = vector.broadcast %46 : vector<8x1xi32> to vector<8x256xi32>
    %48 = arith.cmpi eq, %47, %8 : vector<8x256xi32>
    %49 = arith.extui %48 : vector<8x256xi1> to vector<8x256xi32>
    %50 = arith.sitofp %49 : vector<8x256xi32> to vector<8x256xf32>
    %51 = arith.addf %45, %50 : vector<8x256xf32>
    %52 = vector.extract_strided_slice %0 {offsets = [0, 7], sizes = [8, 1], strides = [1, 1]} : vector<8x8xi32> to vector<8x1xi32>
    %53 = vector.broadcast %52 : vector<8x1xi32> to vector<8x256xi32>
    %54 = arith.cmpi eq, %53, %8 : vector<8x256xi32>
    %55 = arith.extui %54 : vector<8x256xi1> to vector<8x256xi32>
    %56 = arith.sitofp %55 : vector<8x256xi32> to vector<8x256xf32>
    %57 = arith.addf %51, %56 : vector<8x256xf32>
    %c0_3 = arith.constant 0 : index
    %c0_4 = arith.constant 0 : index
    %58 = vector.load %arg4[%c0_3, %c0_4] : memref<8x128xf32, #tpu.memory_space<vmem>>, vector<8x128xf32>
    %c0_5 = arith.constant 0 : index
    %c0_6 = arith.constant 0 : index
    %59 = vector.load %arg3[%c0_5, %c0_6] : memref<512x128xf32, #tpu.memory_space<vmem>>, vector<256x128xf32>
    %cst_7 = arith.constant dense<0.000000e+00> : vector<8x128xf32>
    %60 = tpu.matmul %57, %59, %cst_7 {dimension_numbers = #tpu.dot_dimension_numbers<[1], [0], [0], [1], [0, 0, 1, 1], [], []>} : vector<8x256xf32>, vector<256x128xf32>, vector<8x128xf32> -> vector<8x128xf32>
    %61 = arith.addf %58, %60 : vector<8x128xf32>
    %c0_8 = arith.constant 0 : index
    %c0_9 = arith.constant 0 : index
    %62 = vector.load %arg4[%c0_8, %c0_9] : memref<8x128xf32, #tpu.memory_space<vmem>>, vector<8x128xf32>
    tpu.vector_store %arg4[%c0_8, %c0_9], %61 {strides = array<i32>} : memref<8x128xf32, #tpu.memory_space<vmem>>, vector<8x128xf32>,
    %63 = tpu.iota {dimensions = array<i32: 1>} : vector<8x256xi32>
    %c512_i32_10 = arith.constant 512 : i32
    %64 = arith.muli %arg1, %c512_i32_10 : i32
    %c256_i32 = arith.constant 256 : i32
    %65 = arith.addi %64, %c256_i32 : i32
    %66 = vector.broadcast %65 : i32 to vector<8x256xi32>
    %67 = arith.addi %63, %66 : vector<8x256xi32>
    %cst_11 = arith.constant 0.000000e+00 : f32
    %68 = vector.broadcast %cst_11 : f32 to vector<8x256xf32>
    %69 = vector.extract_strided_slice %0 {offsets = [0, 0], sizes = [8, 1], strides = [1, 1]} : vector<8x8xi32> to vector<8x1xi32>
    %70 = vector.broadcast %69 : vector<8x1xi32> to vector<8x256xi32>
    %71 = arith.cmpi eq, %70, %67 : vector<8x256xi32>
    %72 = arith.extui %71 : vector<8x256xi1> to vector<8x256xi32>
    %73 = arith.sitofp %72 : vector<8x256xi32> to vector<8x256xf32>
    %74 = arith.addf %68, %73 : vector<8x256xf32>
    %75 = vector.extract_strided_slice %0 {offsets = [0, 1], sizes = [8, 1], strides = [1, 1]} : vector<8x8xi32> to vector<8x1xi32>
    %76 = vector.broadcast %75 : vector<8x1xi32> to vector<8x256xi32>
    %77 = arith.cmpi eq, %76, %67 : vector<8x256xi32>
    %78 = arith.extui %77 : vector<8x256xi1> to vector<8x256xi32>
    %79 = arith.sitofp %78 : vector<8x256xi32> to vector<8x256xf32>
    %80 = arith.addf %74, %79 : vector<8x256xf32>
    %81 = vector.extract_strided_slice %0 {offsets = [0, 2], sizes = [8, 1], strides = [1, 1]} : vector<8x8xi32> to vector<8x1xi32>
    %82 = vector.broadcast %81 : vector<8x1xi32> to vector<8x256xi32>
    %83 = arith.cmpi eq, %82, %67 : vector<8x256xi32>
    %84 = arith.extui %83 : vector<8x256xi1> to vector<8x256xi32>
    %85 = arith.sitofp %84 : vector<8x256xi32> to vector<8x256xf32>
    %86 = arith.addf %80, %85 : vector<8x256xf32>
    %87 = vector.extract_strided_slice %0 {offsets = [0, 3], sizes = [8, 1], strides = [1, 1]} : vector<8x8xi32> to vector<8x1xi32>
    %88 = vector.broadcast %87 : vector<8x1xi32> to vector<8x256xi32>
    %89 = arith.cmpi eq, %88, %67 : vector<8x256xi32>
    %90 = arith.extui %89 : vector<8x256xi1> to vector<8x256xi32>
    %91 = arith.sitofp %90 : vector<8x256xi32> to vector<8x256xf32>
    %92 = arith.addf %86, %91 : vector<8x256xf32>
    %93 = vector.extract_strided_slice %0 {offsets = [0, 4], sizes = [8, 1], strides = [1, 1]} : vector<8x8xi32> to vector<8x1xi32>
    %94 = vector.broadcast %93 : vector<8x1xi32> to vector<8x256xi32>
    %95 = arith.cmpi eq, %94, %67 : vector<8x256xi32>
    %96 = arith.extui %95 : vector<8x256xi1> to vector<8x256xi32>
    %97 = arith.sitofp %96 : vector<8x256xi32> to vector<8x256xf32>
    %98 = arith.addf %92, %97 : vector<8x256xf32>
    %99 = vector.extract_strided_slice %0 {offsets = [0, 5], sizes = [8, 1], strides = [1, 1]} : vector<8x8xi32> to vector<8x1xi32>
    %100 = vector.broadcast %99 : vector<8x1xi32> to vector<8x256xi32>
    %101 = arith.cmpi eq, %100, %67 : vector<8x256xi32>
    %102 = arith.extui %101 : vector<8x256xi1> to vector<8x256xi32>
    %103 = arith.sitofp %102 : vector<8x256xi32> to vector<8x256xf32>
    %104 = arith.addf %98, %103 : vector<8x256xf32>
    %105 = vector.extract_strided_slice %0 {offsets = [0, 6], sizes = [8, 1], strides = [1, 1]} : vector<8x8xi32> to vector<8x1xi32>
    %106 = vector.broadcast %105 : vector<8x1xi32> to vector<8x256xi32>
    %107 = arith.cmpi eq, %106, %67 : vector<8x256xi32>
    %108 = arith.extui %107 : vector<8x256xi1> to vector<8x256xi32>
    %109 = arith.sitofp %108 : vector<8x256xi32> to vector<8x256xf32>
    %110 = arith.addf %104, %109 : vector<8x256xf32>
    %111 = vector.extract_strided_slice %0 {offsets = [0, 7], sizes = [8, 1], strides = [1, 1]} : vector<8x8xi32> to vector<8x1xi32>
    %112 = vector.broadcast %111 : vector<8x1xi32> to vector<8x256xi32>
    %113 = arith.cmpi eq, %112, %67 : vector<8x256xi32>
    %114 = arith.extui %113 : vector<8x256xi1> to vector<8x256xi32>
    %115 = arith.sitofp %114 : vector<8x256xi32> to vector<8x256xf32>
    %116 = arith.addf %110, %115 : vector<8x256xf32>
    %c0_12 = arith.constant 0 : index
    %c0_13 = arith.constant 0 : index
    %117 = vector.load %arg4[%c0_12, %c0_13] : memref<8x128xf32, #tpu.memory_space<vmem>>, vector<8x128xf32>
    %c256 = arith.constant 256 : index
    %c0_14 = arith.constant 0 : index
    %118 = vector.load %arg3[%c256, %c0_14] : memref<512x128xf32, #tpu.memory_space<vmem>>, vector<256x128xf32>
    %cst_15 = arith.constant dense<0.000000e+00> : vector<8x128xf32>
    %119 = tpu.matmul %116, %118, %cst_15 {dimension_numbers = #tpu.dot_dimension_numbers<[1], [0], [0], [1], [0, 0, 1, 1], [], []>} : vector<8x256xf32>, vector<256x128xf32>, vector<8x128xf32> -> vector<8x128xf32>
    %120 = arith.addf %117, %119 : vector<8x128xf32>
    %c0_16 = arith.constant 0 : index
    %c0_17 = arith.constant 0 : index
    %121 = vector.load %arg4[%c0_16, %c0_17] : memref<8x128xf32, #tpu.memory_space<vmem>>, vector<8x128xf32>
    tpu.vector_store %arg4[%c0_16, %c0_17], %120 {strides = array<i32>} : memref<8x128xf32, #tpu.memory_space<vmem>>, vector<8x128xf32>,
    %c0_i32_18 = arith.constant 0 : i32
    %122 = arith.cmpi eq, %arg1, %c0_i32_18 : i32
    %123 = arith.extui %122 : i1 to i32
    %c0_i32_19 = arith.constant 0 : i32
    %124 = arith.cmpi ne, %123, %c0_i32_19 : i32
    scf.if %124 {
      %c0_i32_20 = arith.constant 0 : i32
      %125 = vector.broadcast %c0_i32_20 : i32 to vector<8x8xi32>
      %126 = arith.cmpi ne, %0, %125 : vector<8x8xi32>
      %127 = arith.extui %126 : vector<8x8xi1> to vector<8x8xi32>
      %128 = arith.sitofp %127 : vector<8x8xi32> to vector<8x8xf32>
      %cst_21 = arith.constant dense<0.000000e+00> : vector<8xf32>
      %129 = vector.multi_reduction <add>, %128, %cst_21 [1] : vector<8x8xf32> to vector<8xf32>
      %130 = vector.shape_cast %129 : vector<8xf32> to vector<8x1xf32>
      %c0_22 = arith.constant 0 : index
      %c0_23 = arith.constant 0 : index
      %131 = vector.load %arg4[%c0_22, %c0_23] : memref<8x128xf32, #tpu.memory_space<vmem>>, vector<8x128xf32>
      %132 = vector.broadcast %130 : vector<8x1xf32> to vector<8x128xf32>
      %133 = arith.divf %131, %132 : vector<8x128xf32>
      %c0_24 = arith.constant 0 : index
      %c0_25 = arith.constant 0 : index
      %134 = vector.load %arg4[%c0_24, %c0_25] : memref<8x128xf32, #tpu.memory_space<vmem>>, vector<8x128xf32>
      tpu.vector_store %arg4[%c0_24, %c0_25], %133 {strides = array<i32>} : memref<8x128xf32, #tpu.memory_space<vmem>>, vector<8x128xf32>,
    } else {
    }
    return
  }
  func.func @transform_0(%arg0: i32, %arg1: i32) -> (i32, i32) {
    %c0_i32 = arith.constant 0 : i32
    %c0_i32_0 = arith.constant 0 : i32
    return %arg0, %c0_i32 : i32, i32
  }
  func.func @transform_1(%arg0: i32, %arg1: i32) -> (i32, i32) {
    %c0_i32 = arith.constant 0 : i32
    %c0_i32_0 = arith.constant 0 : i32
    return %arg1, %c0_i32 : i32, i32
  }
  func.func @transform_2(%arg0: i32, %arg1: i32) -> (i32, i32) {
    %c0_i32 = arith.constant 0 : i32
    %c0_i32_0 = arith.constant 0 : i32
    return %arg0, %c0_i32 : i32, i32
  }
}

</mosaic_0001>

<bundles_post_ra>
// kernel: tpu_custom_call.1
= control target key start
LH: loop header
LB: loop body
LE: loop exit
PB: predicated region body
PF: predicated region fallthrough
CT: control target
= control target key end

     0   :  { %7 = vsyncpa [#allocation3], 0  ;;  %s1316_s0 = inlined_call_operand.vmem [shape: s32[16,8], index: 0, kind: input, shape index: {}]   ;;  %s1317_s1 = inlined_call_operand.hbm [shape: f32[512,128], index: 1, kind: input, shape index: {}]   ;;  %s1318_s2 = inlined_call_operand.hbm [shape: f32[16,128], index: 2, kind: output, shape index: {}]  }
   0x1   :  { %8 = vsyncpa [#allocation4], 0 }
   0x2   :  { %10 = vsyncpa [#allocation4 + $0x1], 0  ;;  %s1071_s9 = smov 0   ;;  %s1073_s10 = smov 0  }
   0x3   :  { %s1075_s11 = smov 0   ;;  %s1077_s12 = smov 0  }
   0x4   :  { %s1079_s13 = smov 0   ;;  %s1081_s14 = smov 0  }
   0x5 LB: > { %s663_s15 = sadd.s32 4294967295, %s1041_s14   ;;  %s664_s16 = sadd.s32 4294967294, %s1041_s14   ;;  %s1041_s14 = sphi %s1081_s14, %s16_s14   ;;  %s1037_s13 = sphi %s1079_s13, %s1336_s13   ;;  %s1033_s12 = sphi %s1077_s12, %s1335_s12   ;;  %s1029_s11 = sphi %s1075_s11, %s1334_s11   ;;  %s1025_s10 = sphi %s1073_s10, %s1333_s10   ;;  %s1021_s9 = sphi %s1071_s9, %s1332_s9  }
   0x6   : > { %s28_s17 = sadd.s32 1, %s1037_s13  ;;  %s87_s18 = sadd.s32 1, %s1029_s11 }
   0x7   : > { %p30_p0 = scmp.ge.s32.totalorder %s28_s17, 2  ;;  %p97_p1 = scmp.ne.s32.totalorder %s1029_s11, %s1025_s10 }
   0x8   : > { %p98_p2 = scmp.eq.s32.totalorder %s663_s15, 1  ;;  %p103_p3 = scmp.ne.s32.totalorder %s1025_s10, %s1021_s9 }
   0x9   : > { %s1338_s17 = smov (%p30_p0, %s28_s17), 0  ;;  %p104_p5 = scmp.eq.s32.totalorder %s664_s16, 1 }
   0xa   : > { %p1111_p4 = por %p98_p2, %p97_p1  ;;  %s84_s20 = ssub.s32 %s1037_s13, %s1338_s17 }
   0xb   : > { %p665_p6 = scmp.ge.s32.totalorder %s1041_s14, 1  ;;  %p85_p7 = scmp.eq.s32.totalorder %s84_s20, 0 }
   0xc   : > { %s1323_s19 = scalar_select %p1111_p4, 1, 0 }
   0xd   : > { %p1118_p8 = por %p104_p5, %p103_p3  ;;  %p111_p9 = scmp.lt.s32.totalorder %s1041_s14, 3 }
   0xe   : > { %s1124_s22 = scalar_select %p85_p7, %s1029_s11, %s87_s18  }
   0xf   : > { %s1324_s21 = scalar_select %p1118_p8, 1, 0 }
  0x10   : > { %p1126_p10 = pnand %p665_p6, %p111_p9  ;;  %p1130_p11 = scmp.eq.s32.totalorder %s663_s15, 0 }
  0x11   : > { %s1043_s25 = smov [#allocation2]   ;;  %s931_s30 = scalar_lea.hbm %s1317_s1, 8192 }
  0x12   : > { %s1325_s23 = scalar_select %p1126_p10, 1, 0 }
  0x13   : > { %s1326_s24 = scalar_select %p1130_p11, 1, 0 }
  0x14   : > { %p849_p12 = pneg %p1126_p10  ;;  %s126_s26 = sshll.u32 %s1043_s25, 4  ;;  %s127_s26 = int_to_ptr.vmem [resolvable:$true] %s126_s26 }
  0x15   : > { %p932_p0 = scmp.ne.s32.totalorder %s1317_s1, %s931_s30  ;;  %p938_p5 = scmp.lt.u32.totalorder %s931_s30, %s1317_s1 }
  0x16   : > { %p1138_p13 = pnand %p1130_p11, %p849_p12 }
  0x18   : > { %p933_p1 = pneg %p1138_p13 }
  0x1a   : > { %p934_p2 = pnand %p933_p1, %p932_p0 }
  0x1c   : > { %p935_p3 = pneg %p934_p2 }
  0x1e   : > { %p940_p6 = pnand %p938_p5, %p935_p3 }
  0x20   : > { %943 = shalt.err (!%p940_p6)
}
  0x21   : > { %s944_s7 = scalar_lea.vmem %s127_s26, 8192  ;;  %p952_p8 = scmp.lt.s32.totalorder %s127_s26, %s127_s26 }
  0x22   : > { %p945_p7 = scmp.ne.s32.totalorder %s127_s26, %s944_s7  ;;  %p953_p4 = scmp.lt.s32.totalorder %s944_s7, %s944_s7 }
  0x24   : > { %p947_p9 = pnand %p945_p7, %p933_p1  ;;  %p954_p11 = por %p953_p4, %p952_p8 }
  0x26   : > { %p948_p12 = pneg %p947_p9 }
  0x28   : > { %p955_p10 = pnand %p954_p11, %p948_p12 }
  0x2a   : > { %958 = shalt.err (!%p955_p10)
}
  0x2b   : > { %s1044_s8 = smov 128   ;;  %s1045_s15 = smov 8  }
  0x2c   : > { %852 = dma.hbm_to_vmem [thread:$0]  (!%p1138_p13), %s1317_s1, 8192, %s127_s26, [#allocation3], %s1044_s8, %s1044_s8, %s1045_s15  }
  0x2d   : > { %p1328_p0 = scmp.ne.s32.totalorder %s1325_s23, 0 }
  0x2e   : > { %p1329_p2 = scmp.ne.s32.totalorder (!%p1328_p0), %s1326_s24, 0 }
  0x2f   : > { %149 = sbr.rel (%p1328_p0) target bundleno = 452 (0x1c4), region = 28 }
  0x36   : > { %1012 = dma.done.wait (%p1329_p2), [#allocation3], 8192  }
  0x37   : > { %1014 = vsyncadd (%p1329_p2), [#allocation3], 4294959104  ;;  %p170_p4 = scmp.lt.s32.totalorder %s1033_s12, 1  ;;  %v1046_v0 = vmov 2   ;;  %v1047_v1 = vmov 0   ;;  %v293_v3 = vld [vmem:[#allocation2 + $0x80] sm:$0xff] }
  0x38   : > { %922 = vset.pattern.permute.xlu1 %v1046_v0  ;;  %920 = vset.pattern.permute.xlu0 %v1047_v1  ;;  %v294_v4 = vld [vmem:[#allocation2 + $0x88] sm:$0xff]  ;;  %v466_v6 = vld [vmem:[#allocation2 + $0x180] sm:$0xff]  ;;  %v295_v15 = vld [vmem:[#allocation2 + $0x90] sm:$0xff]  ;;  %v1048_v22 = vmov 3   ;;  %v1049_v23 = vmov 1   ;;  %v1050_v38 = vmov 4  }
  0x39   : > { %s171_s20 = scalar_select %p170_p4, %s1033_s12, 1  ;;  %v779_v5 = vpack.c.bf16 %v294_v4, %v293_v3  ;;  %v467_v7 = vld [vmem:[#allocation2 + $0x188] sm:$0xff]  ;;  %v277_v8 = vld [vmem:[#allocation2] sm:$0xff]  ;;  %v296_v16 = vld [vmem:[#allocation2 + $0x98] sm:$0xff]  ;;  %v1051_v39 = vmov 5   ;;  %v1052_v54 = vmov 6  }
  0x3a   : > { %v811_v9 = vpack.c.bf16 %v467_v7, %v466_v6  ;;  %v278_v10 = vld [vmem:[#allocation2 + $0x8] sm:$0xff]  ;;  %v450_v11 = vld [vmem:[#allocation2 + $0x100] sm:$0xff]  ;;  %v468_v17 = vld [vmem:[#allocation2 + $0x190] sm:$0xff]  ;;  %v783_v18 = vpack.c.bf16 %v296_v16, %v295_v15  ;;  %v1053_v58 = vmov 7   ;;  %vm560_vm1 = vcmask 64512   ;;  %s167_s24 = sand.u32 1, %s1025_s10  }
  0x3b   : > { %s671_s25 = sshll.u32 %s171_s20, 3  ;;  %v451_v12 = vld [vmem:[#allocation2 + $0x108] sm:$0xff]  ;;  %780 = vmatprep.subr.bf16.mxu0 %v779_v5  ;;  %v781_v13 = vpack.c.bf16 %v278_v10, %v277_v8  ;;  %v469_v19 = vld [vmem:[#allocation2 + $0x198] sm:$0xff]  ;;  %v279_v20 = vld [vmem:[#allocation2 + $0x10] sm:$0xff]  ;;  %s670_s28 = sshll.u32 %s167_s24, 3 }
  0x3c   : > { %s173_s23 = scalar_lea.vmem %s1316_s0, %s671_s25  ;;  %v813_v14 = vpack.c.bf16 %v451_v12, %v450_v11  ;;  %812 = vmatprep.subr.bf16.mxu1 %v811_v9  ;;  %v280_v21 = vld [vmem:[#allocation2 + $0x18] sm:$0xff]  ;;  %v815_v24 = vpack.c.bf16 %v469_v19, %v468_v17  ;;  %v452_v25 = vld [vmem:[#allocation2 + $0x110] sm:$0xff]  ;;  %v297_v27 = vld [vmem:[#allocation2 + $0xa0] sm:$0xff]  ;;  %s706_s29 = sshll.u32 %s1033_s12, 7 }
  0x3d   : > { %v1169_v2 = vld [vmem:[%s173_s23] sm:$0xff]  ;;  %v453_v26 = vld [vmem:[#allocation2 + $0x118] sm:$0xff]  ;;  %v298_v28 = vld [vmem:[#allocation2 + $0xa8] sm:$0xff]  ;;  %782 = vmatpush3.bf16.msra.mxu0 %v781_v13  ;;  %v785_v31 = vpack.c.bf16 %v280_v21, %v279_v20  ;;  %s169_s30 = scalar_lea.vmem [#allocation5], %s670_s28  ;;  %s1269_s6 = scalar_lea.hbm %s1318_s2, %s706_s29 }
  0x3e   : > { %211 = vperm.xlu1 %922, %v1169_v2   ;;  %189 = vperm.xlu0 %920, %v1169_v2   ;;  %v470_v29 = vld [vmem:[#allocation2 + $0x1a0] sm:$0xff]  ;;  %v471_v30 = vld [vmem:[#allocation2 + $0x1a8] sm:$0xff]  ;;  %v817_v32 = vpack.c.bf16 %v453_v26, %v452_v25  ;;  %v787_v33 = vpack.c.bf16 %v298_v28, %v297_v27  ;;  %v299_v41 = vld [vmem:[#allocation2 + $0xb0] sm:$0xff]  ;;  %vm557_vm0 = vcmp.ne.s32.totalorder %v1169_v2, 0  ;;  %s582_s3 = sshll.u32 %s169_s30, 4  ;;  %s569_s7 = scalar_lea.sflag [#allocation4], %s167_s24  ;;  %s1271_s3 = int_to_ptr.vmem [resolvable:$true] %s582_s3 }
  0x3f   : > { %814 = vmatpush3.bf16.msra.mxu1 %v813_v14  ;;  %784 = vmatprep.subr.bf16.mxu0 %v783_v18  ;;  %v819_v34 = vpack.c.bf16 %v471_v30, %v470_v29  ;;  %v281_v35 = vld [vmem:[#allocation2 + $0x20] sm:$0xff]  ;;  %v282_v36 = vld [vmem:[#allocation2 + $0x28] sm:$0xff]  ;;  %v300_v42 = vld [vmem:[#allocation2 + $0xb8] sm:$0xff]  ;;  %s959_s8 = scalar_lea.vmem %s1271_s3, 128  ;;  %p1330_p10 = scmp.ne.s32.totalorder %s1323_s19, 0 }
  0x40   : > { %816 = vmatprep.subr.bf16.mxu1 %v815_v24  ;;  %v454_v37 = vld [vmem:[#allocation2 + $0x120] sm:$0xff]  ;;  %v455_v40 = vld [vmem:[#allocation2 + $0x128] sm:$0xff]  ;;  %v472_v43 = vld [vmem:[#allocation2 + $0x1b0] sm:$0xff]  ;;  %v789_v45 = vpack.c.bf16 %v282_v36, %v281_v35  ;;  %v791_v47 = vpack.c.bf16 %v300_v42, %v299_v41  ;;  %v1054_v42 = vmov 0.0   ;;  %p960_p8 = scmp.ne.s32.totalorder %s1271_s3, %s959_s8  ;;  %s1055_s12 = smov [#allocation5]  }
  0x41   : > { %v473_v44 = vld [vmem:[#allocation2 + $0x1b8] sm:$0xff]  ;;  %786 = vmatpush3.bf16.msra.mxu0 %v785_v31  ;;  %v821_v46 = vpack.c.bf16 %v455_v40, %v454_v37  ;;  %v283_v48 = vld [vmem:[#allocation2 + $0x30] sm:$0xff]  ;;  %v301_v53 = vld [vmem:[#allocation2 + $0xc0] sm:$0xff]  ;;  %s963_s15 = sshll.u32 %s1055_s12, 4  ;;  %s964_s15 = int_to_ptr.vmem [resolvable:$false] %s963_s15 }
  0x42   : > { %923 = vset.pattern.permute.xlu1 %v1048_v22  ;;  %921 = vset.pattern.permute.xlu0 %v1049_v23  ;;  %v284_v49 = vld [vmem:[#allocation2 + $0x38] sm:$0xff]  ;;  %v823_v50 = vpack.c.bf16 %v473_v44, %v472_v43  ;;  %v456_v51 = vld [vmem:[#allocation2 + $0x130] sm:$0xff]  ;;  %v302_v55 = vld [vmem:[#allocation2 + $0xc8] sm:$0xff]  ;;  %v704_v43 = vsel %vm557_vm0, 1.0, %v1054_v42  ;;  %p961_p11 = pnand %p960_p8, %p1330_p10  ;;  %s965_s16 = scalar_lea.vmem %s964_s15, 256 }
  0x43   : > { %222 = vperm.xlu1 %923, %v1169_v2   ;;  %200 = vperm.xlu0 %921, %v1169_v2   ;;  %v457_v52 = vld [vmem:[#allocation2 + $0x138] sm:$0xff]  ;;  %v474_v56 = vld [vmem:[#allocation2 + $0x1c0] sm:$0xff]  ;;  %v475_v57 = vld [vmem:[#allocation2 + $0x1c8] sm:$0xff]  ;;  %v793_v59 = vpack.c.bf16 %v284_v49, %v283_v48  ;;  %v795_v0 = vpack.c.bf16 %v302_v55, %v301_v53  ;;  %v561_v44 = vsel %vm560_vm1, %v704_v43, 0.0  ;;  %p966_p1 = scmp.lt.s32.totalorder %s1271_s3, %s964_s15  ;;  %p967_p3 = scmp.lt.s32.totalorder %s965_s16, %s959_s8 }
  0x44   : > { %818 = vmatpush3.bf16.msra.mxu1 %v817_v32  ;;  %788 = vmatprep.subr.bf16.mxu0 %v787_v33  ;;  %v825_v60 = vpack.c.bf16 %v457_v52, %v456_v51  ;;  %v285_v61 = vld [vmem:[#allocation2 + $0x40] sm:$0xff]  ;;  %v286_v62 = vld [vmem:[#allocation2 + $0x48] sm:$0xff]  ;;  %v827_v1 = vpack.c.bf16 %v475_v57, %v474_v56  ;;  %v303_v4 = vld [vmem:[#allocation2 + $0xd0] sm:$0xff]  ;;  %p962_p13 = pneg %p961_p11 }
  0x45   : > { %820 = vmatprep.subr.bf16.mxu1 %v819_v34  ;;  %790 = vmatpush3.bf16.msra.mxu0 %v789_v45  ;;  %v458_v63 = vld [vmem:[#allocation2 + $0x140] sm:$0xff]  ;;  %v459_v3 = vld [vmem:[#allocation2 + $0x148] sm:$0xff]  ;;  %v304_v5 = vld [vmem:[#allocation2 + $0xd8] sm:$0xff]  ;;  %v797_v8 = vpack.c.bf16 %v286_v62, %v285_v61  ;;  %v181_v45 = vlaneseq  ;;  %p968_p5 = por %p967_p3, %p966_p1 }
  0x46   : > { %792 = vmatprep.subr.bf16.mxu0 %v791_v47  ;;  %v476_v6 = vld [vmem:[#allocation2 + $0x1d0] sm:$0xff]  ;;  %v477_v7 = vld [vmem:[#allocation2 + $0x1d8] sm:$0xff]  ;;  %v829_v9 = vpack.c.bf16 %v459_v3, %v458_v63  ;;  %v799_v10 = vpack.c.bf16 %v304_v5, %v303_v4  ;;  %v305_v16 = vld [vmem:[#allocation2 + $0xe0] sm:$0xff] }
  0x47   : > { %924 = vset.pattern.permute.xlu1 %v1050_v38  ;;  %925 = vset.pattern.permute.xlu0 %v1051_v39  ;;  %v287_v11 = vld [vmem:[#allocation2 + $0x50] sm:$0xff]  ;;  %v288_v12 = vld [vmem:[#allocation2 + $0x58] sm:$0xff]  ;;  %v831_v14 = vpack.c.bf16 %v477_v7, %v476_v6  ;;  %v306_v17 = vld [vmem:[#allocation2 + $0xe8] sm:$0xff]  ;;  %p969_p6 = pnand %p968_p5, %p962_p13 }
  0x48   : > { %233 = vperm.xlu1 %924, %v1169_v2   ;;  %244 = vperm.xlu0 %925, %v1169_v2   ;;  %v460_v13 = vld [vmem:[#allocation2 + $0x150] sm:$0xff]  ;;  %v461_v15 = vld [vmem:[#allocation2 + $0x158] sm:$0xff]  ;;  %v478_v18 = vld [vmem:[#allocation2 + $0x1e0] sm:$0xff]  ;;  %v801_v20 = vpack.c.bf16 %v288_v12, %v287_v11  ;;  %v803_v22 = vpack.c.bf16 %v306_v17, %v305_v16 }
  0x49   : > { %822 = vmatpush3.bf16.msra.mxu1 %v821_v46  ;;  %794 = vmatpush3.bf16.msra.mxu0 %v793_v59  ;;  %v479_v19 = vld [vmem:[#allocation2 + $0x1e8] sm:$0xff]  ;;  %v833_v21 = vpack.c.bf16 %v461_v15, %v460_v13  ;;  %v289_v23 = vld [vmem:[#allocation2 + $0x60] sm:$0xff]  ;;  %v307_v28 = vld [vmem:[#allocation2 + $0xf0] sm:$0xff]  ;;  %v1181_v46 = vand.u32 127, %v181_v45 }
  0x4a   : > { %824 = vmatprep.subr.bf16.mxu1 %v823_v50  ;;  %796 = vmatprep.subr.bf16.mxu0 %v795_v0  ;;  %v290_v24 = vld [vmem:[#allocation2 + $0x68] sm:$0xff]  ;;  %v462_v25 = vld [vmem:[#allocation2 + $0x160] sm:$0xff]  ;;  %v835_v26 = vpack.c.bf16 %v479_v19, %v478_v18  ;;  %v308_v29 = vld [vmem:[#allocation2 + $0xf8] sm:$0xff] }
  0x4b   : > { %v463_v27 = vld [vmem:[#allocation2 + $0x168] sm:$0xff]  ;;  %v480_v30 = vld [vmem:[#allocation2 + $0x1f0] sm:$0xff]  ;;  %v481_v31 = vld [vmem:[#allocation2 + $0x1f8] sm:$0xff]  ;;  %v805_v32 = vpack.c.bf16 %v290_v24, %v289_v23  ;;  %v807_v34 = vpack.c.bf16 %v308_v29, %v307_v28  ;;  %v1184_v47 = vadd.s32 128, %v1181_v46  ;;  %v1187_v48 = vadd.s32 256, %v1181_v46 }
  0x4c   : > { %926 = vset.pattern.permute.xlu1 %v1052_v54  ;;  %928 = vset.pattern.permute.xlu0 %v1053_v58  ;;  %v837_v33 = vpack.c.bf16 %v463_v27, %v462_v25  ;;  %v291_v35 = vld [vmem:[#allocation2 + $0x70] sm:$0xff]  ;;  %v292_v36 = vld [vmem:[#allocation2 + $0x78] sm:$0xff]  ;;  %v839_v37 = vpack.c.bf16 %v481_v31, %v480_v30 }
  0x4d   : > { %255 = vperm.xlu1 %926, %v1169_v2   ;;  %826 = vmatpush3.bf16.msra.mxu1 %v825_v60  ;;  %v464_v38 = vld [vmem:[#allocation2 + $0x170] sm:$0xff]  ;;  %v465_v39 = vld [vmem:[#allocation2 + $0x178] sm:$0xff]  ;;  %v809_v40 = vpack.c.bf16 %v292_v36, %v291_v35 }
  0x4e   : > { %828 = vmatprep.subr.bf16.mxu1 %v827_v1  ;;  %798 = vmatpush3.bf16.msra.mxu0 %v797_v8  ;;  %v841_v41 = vpack.c.bf16 %v465_v39, %v464_v38 }
  0x4f   : > { %800 = vmatprep.subr.bf16.mxu0 %v799_v10 }
  0x51   : > { %927 = vset.pattern.permute.xlu1 %v1053_v58  ;;  %830 = vmatpush3.bf16.msra.mxu1 %v829_v9 }
  0x52   : > { %266 = vperm.xlu1 %927, %v1169_v2   ;;  %832 = vmatprep.subr.bf16.mxu1 %v831_v14  ;;  %v1190_v2 = vadd.s32 256, %v1184_v47 }
  0x53   : > { %802 = vmatpush3.bf16.msra.mxu0 %v801_v20 }
  0x54   : > { %804 = vmatprep.subr.bf16.mxu0 %v803_v22 }
  0x55   : > { %834 = vmatpush3.bf16.msra.mxu1 %v833_v21 }
  0x56   : > { %836 = vmatprep.subr.bf16.mxu1 %v835_v26 }
  0x57   : > { %806 = vmatpush3.bf16.msra.mxu0 %v805_v32 }
  0x58   : > { %808 = vmatprep.subr.bf16.mxu0 %v807_v34 }
  0x59   : > { %838 = vmatpush3.bf16.msra.mxu1 %v837_v33 }
  0x5a   : > { %840 = vmatprep.subr.bf16.mxu1 %v839_v37 }
  0x5b   : > { %810 = vmatpush3.bf16.msra.mxu0 %v809_v40 }
  0x5d   : > { %842 = vmatpush3.bf16.msra.mxu1 %v841_v41 }
  0x67   : > { %562 = vadd.xlane.f32.xlu0 %v561_v44 }
  0xbd   : > { %v212_v49 = vpop.permute.xlu1 %211  ;;  %v190_v50 = vpop.permute.xlu0 %189 }
  0xbe   : > { %vm213_vm2 = vcmp.eq.s32.totalorder %v212_v49, %v1181_v46  ;;  %vm214_vm3 = vcmp.eq.s32.totalorder %v212_v49, %v1184_v47  ;;  %vm401_vm4 = vcmp.eq.s32.totalorder %v212_v49, %v1187_v48  ;;  %vm402_vm5 = vcmp.eq.s32.totalorder %v212_v49, %v1190_v2 }
  0xbf   : > { %vm191_vm6 = vcmp.eq.s32.totalorder %v190_v50, %v1181_v46  ;;  %vm192_vm7 = vcmp.eq.s32.totalorder %v190_v50, %v1184_v47  ;;  %vm385_vm8 = vcmp.eq.s32.totalorder %v190_v50, %v1187_v48  ;;  %vm386_vm9 = vcmp.eq.s32.totalorder %v190_v50, %v1190_v2 }
  0xc0   : > { %v676_v51 = vsel %vm213_vm2, 1.0, %v1054_v42  ;;  %v677_v52 = vsel %vm214_vm3, 1.0, %v1054_v42  ;;  %v692_v53 = vsel %vm401_vm4, 1.0, %v1054_v42  ;;  %v693_v54 = vsel %vm402_vm5, 1.0, %v1054_v42 }
  0xc1   : > { %v672_v55 = vsel %vm191_vm6, 1.0, %v1054_v42  ;;  %v673_v58 = vsel %vm192_vm7, 1.0, %v1054_v42  ;;  %v688_v59 = vsel %vm385_vm8, 1.0, %v1054_v42  ;;  %v689_v60 = vsel %vm386_vm9, 1.0, %v1054_v42 }
  0xc2   : > { %v223_v56 = vpop.permute.xlu1 %222  ;;  %v201_v57 = vpop.permute.xlu0 %200 }
  0xc3   : > { %vm224_vm10 = vcmp.eq.s32.totalorder %v223_v56, %v1181_v46  ;;  %vm225_vm11 = vcmp.eq.s32.totalorder %v223_v56, %v1184_v47  ;;  %vm409_vm12 = vcmp.eq.s32.totalorder %v223_v56, %v1187_v48  ;;  %vm410_vm13 = vcmp.eq.s32.totalorder %v223_v56, %v1190_v2 }
  0xc4   : > { %v678_v61 = vsel %vm224_vm10, 1.0, %v1054_v42  ;;  %vm202_vm14 = vcmp.eq.s32.totalorder %v201_v57, %v1181_v46  ;;  %vm203_vm15 = vcmp.eq.s32.totalorder %v201_v57, %v1184_v47  ;;  %vm393_vm0 = vcmp.eq.s32.totalorder %v201_v57, %v1187_v48 }
  0xc5   : > { %vm394_vm1 = vcmp.eq.s32.totalorder %v201_v57, %v1190_v2  ;;  %v674_v62 = vsel %vm202_vm14, 1.0, %v1054_v42  ;;  %v675_v63 = vsel %vm203_vm15, 1.0, %v1054_v42  ;;  %v690_v0 = vsel %vm393_vm0, 1.0, %v1054_v42 }
  0xc6   : > { %v691_v1 = vsel %vm394_vm1, 1.0, %v1054_v42  ;;  %v679_v3 = vsel %vm225_vm11, 1.0, %v1054_v42  ;;  %v208_v4 = vadd.f32 %v674_v62, %v672_v55  ;;  %v209_v5 = vadd.f32 %v675_v63, %v673_v58 }
  0xc7   : > { %v399_v6 = vadd.f32 %v690_v0, %v688_v59  ;;  %v234_v7 = vpop.permute.xlu1 %233  ;;  %v400_v8 = vadd.f32 %v691_v1, %v689_v60  ;;  %v245_v9 = vpop.permute.xlu0 %244  ;;  %v694_v10 = vsel %vm409_vm12, 1.0, %v1054_v42  ;;  %v695_v29 = vsel %vm410_vm13, 1.0, %v1054_v42 }
  0xc8   : > { %vm235_vm2 = vcmp.eq.s32.totalorder %v234_v7, %v1181_v46  ;;  %vm236_vm3 = vcmp.eq.s32.totalorder %v234_v7, %v1184_v47  ;;  %vm417_vm4 = vcmp.eq.s32.totalorder %v234_v7, %v1187_v48  ;;  %v219_v11 = vadd.f32 %v676_v51, %v208_v4 }
  0xc9   : > { %v220_v12 = vadd.f32 %v677_v52, %v209_v5  ;;  %v407_v13 = vadd.f32 %v692_v53, %v399_v6  ;;  %v680_v14 = vsel %vm235_vm2, 1.0, %v1054_v42  ;;  %v681_v15 = vsel %vm236_vm3, 1.0, %v1054_v42 }
  0xca   : > { %vm418_vm5 = vcmp.eq.s32.totalorder %v234_v7, %v1190_v2  ;;  %v696_v16 = vsel %vm417_vm4, 1.0, %v1054_v42  ;;  %v230_v17 = vadd.f32 %v678_v61, %v219_v11  ;;  %vm246_vm6 = vcmp.eq.s32.totalorder %v245_v9, %v1181_v46 }
  0xcb   : > { %v415_v18 = vadd.f32 %v694_v10, %v407_v13  ;;  %vm247_vm7 = vcmp.eq.s32.totalorder %v245_v9, %v1184_v47  ;;  %v408_v19 = vadd.f32 %v693_v54, %v400_v8  ;;  %v682_v20 = vsel %vm246_vm6, 1.0, %v1054_v42 }
  0xcc   : > { %vm425_vm8 = vcmp.eq.s32.totalorder %v245_v9, %v1187_v48  ;;  %v256_v21 = vpop.permute.xlu1 %255  ;;  %v231_v22 = vadd.f32 %v679_v3, %v220_v12  ;;  %v241_v23 = vadd.f32 %v680_v14, %v230_v17  ;;  %vm426_vm9 = vcmp.eq.s32.totalorder %v245_v9, %v1190_v2 }
  0xcd   : > { %v423_v24 = vadd.f32 %v696_v16, %v415_v18  ;;  %vm257_vm10 = vcmp.eq.s32.totalorder %v256_v21, %v1181_v46  ;;  %v698_v25 = vsel %vm425_vm8, 1.0, %v1054_v42  ;;  %v683_v28 = vsel %vm247_vm7, 1.0, %v1054_v42 }
  0xce   : > { %v684_v26 = vsel %vm257_vm10, 1.0, %v1054_v42  ;;  %v242_v27 = vadd.f32 %v681_v15, %v231_v22  ;;  %v697_v30 = vsel %vm418_vm5, 1.0, %v1054_v42  ;;  %v252_v31 = vadd.f32 %v682_v20, %v241_v23 }
  0xcf   : > { %vm258_vm11 = vcmp.eq.s32.totalorder %v256_v21, %v1184_v47  ;;  %vm433_vm12 = vcmp.eq.s32.totalorder %v256_v21, %v1187_v48  ;;  %v416_v34 = vadd.f32 %v695_v29, %v408_v19  ;;  %v431_v35 = vadd.f32 %v698_v25, %v423_v24 }
  0xd0   : > { %v253_v32 = vadd.f32 %v683_v28, %v242_v27  ;;  %v685_v33 = vsel %vm258_vm11, 1.0, %v1054_v42  ;;  %v699_v37 = vsel %vm426_vm9, 1.0, %v1054_v42  ;;  %vm434_vm13 = vcmp.eq.s32.totalorder %v256_v21, %v1190_v2 }
  0xd1   : > { %v267_v36 = vpop.permute.xlu1 %266  ;;  %v263_v38 = vadd.f32 %v684_v26, %v252_v31  ;;  %v700_v40 = vsel %vm433_vm12, 1.0, %v1054_v42  ;;  %v424_v44 = vadd.f32 %v697_v30, %v416_v34  ;;  %v701_v49 = vsel %vm434_vm13, 1.0, %v1054_v42 }
  0xd2   : > { %vm268_vm14 = vcmp.eq.s32.totalorder %v267_v36, %v1181_v46  ;;  %vm441_vm15 = vcmp.eq.s32.totalorder %v267_v36, %v1187_v48  ;;  %v264_v39 = vadd.f32 %v685_v33, %v253_v32  ;;  %vm269_vm0 = vcmp.eq.s32.totalorder %v267_v36, %v1184_v47 }
  0xd3   : > { %v686_v41 = vsel %vm268_vm14, 1.0, %v1054_v42  ;;  %v687_v43 = vsel %vm269_vm0, 1.0, %v1054_v42  ;;  %vm442_vm1 = vcmp.eq.s32.totalorder %v267_v36, %v1190_v2  ;;  %v702_v46 = vsel %vm441_vm15, 1.0, %v1054_v42 }
  0xd4   : > { %v275_v45 = vadd.f32 %v687_v43, %v264_v39  ;;  %v274_v50 = vadd.f32 %v686_v41, %v263_v38  ;;  %v432_v48 = vadd.f32 %v699_v37, %v424_v44  ;;  %v703_v47 = vsel %vm442_vm1, 1.0, %v1054_v42 }
  0xd5   : > { %v439_v51 = vadd.f32 %v700_v40, %v431_v35 }
  0xd6   : > { %373 = vmatprep.mubr.f32.mxu0 %v275_v45  ;;  %v440_v52 = vadd.f32 %v701_v49, %v432_v48 }
  0xd7   : > { %374 = vmatmul.mubr.f32.vlgmr.msra.gmra.mrb[0].mxu0 %v274_v50  ;;  %v447_v53 = vadd.f32 %v702_v46, %v439_v51 }
  0xd8   : > { %v448_v54 = vadd.f32 %v703_v47, %v440_v52 }
  0xda   : > { %546 = vmatprep.mubr.f32.mxu1 %v448_v54 }
  0xdb   : > { %547 = vmatmul.mubr.f32.vlgmr.msra.gmra.mrb[0].mxu1 %v447_v53 }
  0xf4   : > { %v563_v55 = vpop.xlane.xlu0 %562 }
  0xf5   : > { %929 = vrcp.f32 %v563_v55 }
  0xff   : > { %v930_v42 = vpop.eup %929 }
 0x1aa   : > { %v741_v56 = vpop.f32.mrb[0].mxu0 }
 0x1ab   : > { %v742_v2 = vpop.f32.mrb[1].mxu0 }
 0x1ac   : > { %v743_v57 = vadd.f32 %v742_v2, %v741_v56 }
 0x1ae   : > { %v776_v58 = vpop.f32.mrb[0].mxu1 }
 0x1af   : > { %v777_v59 = vpop.f32.mrb[1].mxu1 }
 0x1b0   : > { %v778_v60 = vadd.f32 %v777_v59, %v776_v58 }
 0x1b2   : > { %v552_v61 = vadd.f32 %v778_v60, %v743_v57 }
 0x1b4   : > { %v566_v62 = vmul.f32 %v930_v42, %v552_v61 }
 0x1b6   : > { %567 = vst [vmem:[%s169_s30] sm:$0xff] %v566_v62 }
 0x1b7   : > { %972 = shalt.err (!%p969_p6)
}
 0x1b8   : > { %s973_s18 = scalar_lea.hbm %s1269_s6, 128  ;;  %s977_s27 = scalar_lea.hbm %s1318_s2, 256 }
 0x1b9   : > { %p974_p7 = scmp.ne.s32.totalorder %s1269_s6, %s973_s18  ;;  %p978_p0 = scmp.lt.u32.totalorder %s1269_s6, %s1318_s2 }
 0x1ba   : > { %p979_p2 = scmp.lt.u32.totalorder %s977_s27, %s973_s18  ;;  %p981_p8 = scmp.lt.u32.totalorder %s973_s18, %s1269_s6 }
 0x1bb   : > { %p975_p9 = pnand %p974_p7, %p1330_p10 }
 0x1bc   : > { %p980_p4 = por %p979_p2, %p978_p0 }
 0x1bd   : > { %p976_p12 = pneg %p975_p9 }
 0x1be   : > { %p982_p11 = por %p981_p8, %p980_p4 }
 0x1c0   : > { %p983_p13 = pnand %p982_p11, %p976_p12 }
 0x1c2   : > { %986 = shalt.err (!%p983_p13)
}
 0x1c3   : > { %847 = dma.vmem_to_hbm [thread:$0]  (%p1330_p10), %s1271_s3, 128, %s1269_s6, %s569_s7  }
 0x1c4 PF: > { %p859_p1 = scmp.ge.s32.totalorder %s1041_s14, 2  ;;  %s594_s24 = sand.u32 1, %s1021_s9  }
 0x1c5   : > { %p1331_p3 = scmp.ne.s32.totalorder %s1324_s21, 0  ;;  %s595_s28 = scalar_lea.sflag [#allocation4], %s594_s24 }
 0x1c7   : > { %p854_p5 = pnand %p859_p1, %p1331_p3 }
 0x1c9   : > { %1016 = dma.done.wait (!%p854_p5), %s595_s28, 128  }
 0x1ca   : > { %1018 = vsyncadd (!%p854_p5), %s595_s28, 4294967168  ;;  %s16_s14 = sadd.s32 1, %s1041_s14   ;;  %s1332_s9 = smov %s1025_s10 }
 0x1cb   : > { %p13_p6 = scmp.ge.s32.totalorder %s16_s14, 4   ;;  %s1333_s10 = smov %s1029_s11 }
 0x1cc   : > { %s1334_s11 = smov %s1124_s22  ;;  %s1335_s12 = smov %s1037_s13 }
 0x1cd   : > { %s1336_s13 = smov %s1338_s17  ;;  %15 = sbr.rel (!%p13_p6) target bundleno = 5 (0x5), region = 77 }
 0x1d4   :  { %600 = vsyncpa [#allocation3], 1 }
 0x1d5   :  { %602 = vsyncpa [#allocation3 + $0x1], 1 }
 0x1d6   :  { %603 = vsyncpa [#allocation4], 1 }
 0x1d7   :  { %605 = vsyncpa [#allocation4 + $0x1], 1 }

</bundles_post_ra>
